<compile_context>
chip_gen: v5e
topology: v5e:2x2
jax: 0.10.0
libtpu: 0.0.40
codegen_flags: <defaults>
</compile_context>

<pallas_src>
import functools

import jax
import jax.numpy as jnp
from jax.experimental import pallas as pl
from jax.experimental.pallas import tpu as pltpu


def _group_max_with_bias(m, b, k, d_out):
    """m, b: (1, k*d_out) f32. Add bias, then elementwise max over the k groups."""
    m = m + b
    res = m[:, 0:d_out]
    for kk in range(1, k):
        res = jnp.maximum(res, m[:, kk * d_out:(kk + 1) * d_out])
    return res                                                   # (1, d_out)


def maxout_single_block_kernel(x_ref, w_ref, b_ref, o_ref, *, k, d_out):
    # One fused MXU matmul over all k heads: (B, Din) @ (Din, k*Dout).
    acts = jnp.dot(x_ref[...], w_ref[...], preferred_element_type=jnp.float32)
    # One cross-sublane (XLU) max over the batch axis, then bias + k-group max.
    m = jnp.max(acts, axis=0, keepdims=True)                     # (1, k*Dout)
    o_ref[...] = _group_max_with_bias(m, b_ref[...], k, d_out)   # (1, Dout)


def maxout_batch_tiled_kernel(x_ref, w_ref, b_ref, o_ref, m_scratch, *, k, d_out):
    step = pl.program_id(0)

    @pl.when(step == 0)
    def _():
        m_scratch[...] = jnp.full_like(m_scratch, -jnp.inf)

    # (tile_b, Din) @ (Din, k*Dout) on the MXU; weight block resident across steps.
    acts = jnp.dot(x_ref[...], w_ref[...], preferred_element_type=jnp.float32)
    m_scratch[...] = jnp.maximum(m_scratch[...],
                                 jnp.max(acts, axis=0, keepdims=True))

    @pl.when(step == pl.num_programs(0) - 1)
    def _():
        o_ref[...] = _group_max_with_bias(m_scratch[...], b_ref[...], k, d_out)


def init_maxout_params(key, d_in, d_out, k):
    """nn.Linear-style init; layout work done ONCE here, not per forward.

    Returns:
      w      : (k, Din, Dout)  per-head weights (W_torch_k.T), for the reference
      b      : (k, Dout)       per-head biases
      w_flat : (Din, k*Dout)   column kk*Dout + o is output column o of head kk
      b_flat : (1, k*Dout)     matching flat bias layout
    """
    kw, kb = jax.random.split(key)
    bound = 1.0 / (d_in ** 0.5)
    w = jax.random.uniform(kw, (k, d_in, d_out), jnp.float32, -bound, bound)
    b = jax.random.uniform(kb, (k, d_out), jnp.float32, -bound, bound)
    w_flat = jnp.transpose(w, (1, 0, 2)).reshape(d_in, k * d_out)
    b_flat = b.reshape(1, k * d_out)
    return w, b, w_flat, b_flat


def maxout_forward(x, w_flat, b_flat, *, k, tile_b=128):
    """x: (B, Din) f32, w_flat: (Din, k*Dout) f32, b_flat: (1, k*Dout) f32.
    Returns (Dout,) f32 = max over both k and batch (torch vstack + max dim=0)."""
    B, d_in = x.shape
    kd = w_flat.shape[1]
    d_out = kd // k

    if tile_b is None or B <= tile_b:
        # Single invocation: no grid, no double-buffering, whole arrays in VMEM.
        out = pl.pallas_call(
            functools.partial(maxout_single_block_kernel, k=k, d_out=d_out),
            out_shape=jax.ShapeDtypeStruct((1, d_out), jnp.float32),
            in_specs=[
                pl.BlockSpec(memory_space=pltpu.MemorySpace.VMEM),
                pl.BlockSpec(memory_space=pltpu.MemorySpace.VMEM),
                pl.BlockSpec(memory_space=pltpu.MemorySpace.VMEM),
            ],
            out_specs=pl.BlockSpec(memory_space=pltpu.MemorySpace.VMEM),
        )(x, w_flat, b_flat)
        return out[0]

    # Batch-tiled path: stream batch tiles, keep a running max in VMEM scratch.
    assert B % tile_b == 0, "batch must be a multiple of tile_b"
    n_steps = B // tile_b
    out = pl.pallas_call(
        functools.partial(maxout_batch_tiled_kernel, k=k, d_out=d_out),
        out_shape=jax.ShapeDtypeStruct((1, d_out), jnp.float32),
        grid_spec=pltpu.PrefetchScalarGridSpec(
            num_scalar_prefetch=0,
            grid=(n_steps,),
            in_specs=[
                pl.BlockSpec((tile_b, d_in), lambda i: (i, 0)),
                pl.BlockSpec((d_in, kd), lambda i: (0, 0)),      # weight resident
                pl.BlockSpec((1, kd), lambda i: (0, 0)),
            ],
            out_specs=pl.BlockSpec((1, d_out), lambda i: (0, 0)),
            scratch_shapes=[pltpu.VMEM((1, kd), jnp.float32)],
        ),
        compiler_params=pltpu.CompilerParams(
            dimension_semantics=("arbitrary",)),
    )(x, w_flat, b_flat)
    return out[0]


def maxout_reference(x, w, b):
    """Pure-JAX reference of the exact torch semantics (vstack -> max over dim 0)."""
    acts = jnp.einsum("bi,kio->kbo", x, w) + b[:, None, :]       # (k, B, Dout)
    return jnp.max(acts.reshape(-1, acts.shape[-1]), axis=0)     # (Dout,)


if __name__ == "__main__":
    Din, Dout, K = 32, 128, 3
    key = jax.random.PRNGKey(0)
    kp, kx1, kx2 = jax.random.split(key, 3)
    w, b, w_flat, b_flat = init_maxout_params(kp, Din, Dout, K)

    # Path 1: small batch (matches the module's typical use) — grid-less kernel.
    B1 = 8
    x1 = jax.random.normal(kx1, (B1, Din), dtype=jnp.float32)
    out1 = jax.block_until_ready(maxout_forward(x1, w_flat, b_flat, k=K))
    ref1 = maxout_reference(x1, w, b)
    assert out1.shape == (Dout,)
    assert jnp.allclose(out1, ref1, atol=1e-5, rtol=1e-5)

    # Path 2: larger batch — batch-tiled kernel with running max in VMEM scratch.
    B2, TILE_B = 256, 128
    x2 = jax.random.normal(kx2, (B2, Din), dtype=jnp.float32)
    out2 = jax.block_until_ready(maxout_forward(x2, w_flat, b_flat, k=K, tile_b=TILE_B))
    ref2 = maxout_reference(x2, w, b)
    assert out2.shape == (Dout,)
    assert jnp.allclose(out2, ref2, atol=1e-5, rtol=1e-5)

    print("KERNEL_OK")
</pallas_src>

<mosaic_0001>
module attributes {stable_mosaic.version = 11 : i64} {
  func.func @maxout_single_block_kernel(%arg0: memref<8x32xf32, #tpu.memory_space<vmem>>, %arg1: memref<32x384xf32, #tpu.memory_space<vmem>>, %arg2: memref<1x384xf32, #tpu.memory_space<vmem>>, %arg3: memref<1x128xf32, #tpu.memory_space<vmem>>) attributes {dimension_semantics = [], scalar_prefetch = 0 : i64, scratch_operands = 0 : i64, tpu.core_type = #tpu.core_type<tc>} {
    %c0 = arith.constant 0 : index
    %c0_0 = arith.constant 0 : index
    %0 = vector.load %arg0[%c0, %c0_0] : memref<8x32xf32, #tpu.memory_space<vmem>>, vector<8x32xf32>
    %c0_1 = arith.constant 0 : index
    %c0_2 = arith.constant 0 : index
    %1 = vector.load %arg1[%c0_1, %c0_2] : memref<32x384xf32, #tpu.memory_space<vmem>>, vector<32x384xf32>
    %cst = arith.constant dense<0.000000e+00> : vector<8x384xf32>
    %2 = tpu.matmul %0, %1, %cst {dimension_numbers = #tpu.dot_dimension_numbers<[1], [0], [0], [1], [0, 0, 1, 1], [], []>} : vector<8x32xf32>, vector<32x384xf32>, vector<8x384xf32> -> vector<8x384xf32>
    %cst_3 = arith.constant dense<0xFF800000> : vector<384xf32>
    %3 = vector.multi_reduction <maximumf>, %2, %cst_3 [0] : vector<8x384xf32> to vector<384xf32>
    %4 = vector.shape_cast %3 : vector<384xf32> to vector<1x384xf32>
    %c0_4 = arith.constant 0 : index
    %c0_5 = arith.constant 0 : index
    %5 = vector.load %arg2[%c0_4, %c0_5] : memref<1x384xf32, #tpu.memory_space<vmem>>, vector<1x384xf32>
    %6 = arith.addf %4, %5 : vector<1x384xf32>
    %7 = vector.extract_strided_slice %6 {offsets = [0, 0], sizes = [1, 128], strides = [1, 1]} : vector<1x384xf32> to vector<1x128xf32>
    %8 = vector.extract_strided_slice %6 {offsets = [0, 128], sizes = [1, 128], strides = [1, 1]} : vector<1x384xf32> to vector<1x128xf32>
    %9 = arith.maximumf %7, %8 : vector<1x128xf32>
    %10 = vector.extract_strided_slice %6 {offsets = [0, 256], sizes = [1, 128], strides = [1, 1]} : vector<1x384xf32> to vector<1x128xf32>
    %11 = arith.maximumf %9, %10 : vector<1x128xf32>
    %c0_6 = arith.constant 0 : index
    %c0_7 = arith.constant 0 : index
    %12 = vector.load %arg3[%c0_6, %c0_7] : memref<1x128xf32, #tpu.memory_space<vmem>>, vector<1x128xf32>
    tpu.vector_store %arg3[%c0_6, %c0_7], %11 {strides = array<i32>} : memref<1x128xf32, #tpu.memory_space<vmem>>, vector<1x128xf32>,
    return
  }
}

</mosaic_0001>

<bundles_post_ra>
// kernel: tpu_custom_call.1
= control target key start
LH: loop header
LB: loop body
LE: loop exit
PB: predicated region body
PF: predicated region fallthrough
CT: control target
= control target key end

     0   :  { %8 = vsyncpa [#allocation3], 0  ;;  %s334_s0 = inlined_call_operand.hbm [shape: f32[8,32], index: 0, kind: input, shape index: {}]   ;;  %s335_s1 = inlined_call_operand.hbm [shape: f32[32,384], index: 1, kind: input, shape index: {}]   ;;  %s336_s2 = inlined_call_operand.hbm [shape: f32[1,384], index: 2, kind: input, shape index: {}]   ;;  %s337_s3 = inlined_call_operand.hbm [shape: f32[1,128], index: 3, kind: output, shape index: {}]  }
   0x1   :  { %9 = vsyncpa [#allocation6], 0  ;;  %s26_s14 = sshll.u32 %s335_s1, 4  ;;  %s27_s14 = int_to_ptr.hbm [resolvable:$true] %s26_s14 }
   0x2   :  { %10 = vsyncpa [#allocation4], 0  ;;  %s296_s15 = smov [#allocation5]   ;;  %s16_s19 = sshll.u32 %s334_s0, 4  ;;  %s17_s19 = int_to_ptr.hbm [resolvable:$true] %s16_s19 }
   0x3   :  { %s28_s16 = sshll.u32 %s296_s15, 4  ;;  %s297_s20 = smov 384   ;;  %s29_s16 = int_to_ptr.vmem [resolvable:$true] %s28_s16 }
   0x4   :  { %s298_s21 = smov 24   ;;  %s299_s22 = smov [#allocation2]  }
   0x5   :  { %34 = dma.hbm_to_vmem [thread:$0]  %s27_s14, 1536, %s29_s16, [#allocation6], %s297_s20, %s297_s20, %s298_s21  }
   0x6   :  { %s18_s23 = sshll.u32 %s299_s22, 4  ;;  %s40_s26 = sshll.u32 %s336_s2, 4  ;;  %s19_s23 = int_to_ptr.vmem [resolvable:$true] %s18_s23  ;;  %s41_s26 = int_to_ptr.hbm [resolvable:$true] %s40_s26 }
   0x7   :  { %21 = dma.hbm_to_vmem [thread:$0]  %s17_s19, 128, %s19_s23, [#allocation3]  }
   0x8   :  { %s300_s1 = smov [#allocation7]  }
   0x9   :  { %s42_s27 = sshll.u32 %s300_s1, 4  ;;  %s43_s27 = int_to_ptr.vmem [resolvable:$true] %s42_s27 }
   0xa   :  { %45 = dma.hbm_to_vmem [thread:$0]  %s41_s26, 48, %s43_s27, [#allocation6]  }
   0xb   :  { %290 = dma.done.wait [#allocation3], 128  }
   0xc   :  { %291 = vsyncadd [#allocation3], 4294967168 }
   0xd   :  { %292 = dma.done.wait [#allocation6], 1584  }
   0xe   :  { %293 = vsyncadd [#allocation6], 4294965712  ;;  %v68_v0 = vld [vmem:[#allocation5 + $0x48] sm:$0xff]  ;;  %v69_v1 = vld [vmem:[#allocation5 + $0x50] sm:$0xff]  ;;  %vm71_vm0 = vcmask 261120   ;;  %s301_s0 = smov [#allocation8]  }
   0xf   :  { %v70_v2 = vld [vmem:[#allocation5 + $0x58] sm:$0xff]  ;;  %87 = vmatpush.msra.mxu0 %v68_v0  ;;  %107 = vmatpush.msra.mxu1 %v69_v1  ;;  %v65_v3 = vld [vmem:[#allocation5 + $0x30] sm:$0xff]  ;;  %v67_v5 = vld [vmem:[#allocation5 + $0x40] sm:$0xff]  ;;  %s172_s2 = sshll.u32 %s301_s0, 4  ;;  %s174_s30 = sshll.u32 %s337_s3, 4  ;;  %s173_s2 = int_to_ptr.vmem [resolvable:$true] %s172_s2  ;;  %s175_s30 = int_to_ptr.hbm [resolvable:$true] %s174_s30 }
  0x10   :  { %v66_v4 = vld [vmem:[#allocation5 + $0x38] sm:$0xff]  ;;  %127 = vmatpush.msra.mxu2 %v70_v2  ;;  %v63_v7 = vld [vmem:[#allocation5 + $0x20] sm:$0xff]  ;;  %v64_v8 = vld [vmem:[#allocation5 + $0x28] sm:$0xff] }
  0x11   :  { %v62_v6 = vld [vmem:[#allocation5 + $0x18] sm:$0xff]  ;;  %88 = vmatpush.msra.mxu0 %v65_v3  ;;  %108 = vmatpush.msra.mxu1 %v66_v4  ;;  %v59_v9 = vld [vmem:[#allocation5] sm:$0xff]  ;;  %v60_v10 = vld [vmem:[#allocation5 + $0x8] sm:$0xff] }
  0x12   :  { %128 = vmatpush.msra.mxu2 %v67_v5  ;;  %v61_v11 = vld [vmem:[#allocation5 + $0x10] sm:$0xff]  ;;  %v58_v12 = vld [vmem:[#allocation2] sm:$0xff]  ;;  %v153_v23 = vld [vmem:[#allocation7] sm:$0x7] }
  0x13   :  { %89 = vmatpush.msra.mxu0 %v62_v6  ;;  %109 = vmatpush.msra.mxu1 %v63_v7  ;;  %v155_v29 = vperm.slane %v153_v23, 0  ;;  %v156_v32 = vperm.slane %v153_v23, 1  ;;  %v157_v38 = vperm.slane %v153_v23, 2 }
  0x14   :  { %129 = vmatpush.msra.mxu2 %v64_v8 }
  0x15   :  { %90 = vmatpush.msra.mxu0 %v59_v9  ;;  %110 = vmatpush.msra.mxu1 %v60_v10 }
  0x16   :  { %130 = vmatpush.msra.mxu2 %v61_v11  ;;  %185 = vmatmul.msk.f32.vlgmr.msra.gmra.mxu0 %vm71_vm0, %v58_v12 }
  0x17   :  { %186 = vmatmul.msk.f32.vlgmr.msra.gmra.mxu1 %vm71_vm0, %v58_v12  ;;  %187 = vmatmul.msk.f32.vlgmr.msra.gmra.mxu2 %vm71_vm0, %v58_v12 }
  0x93   :  { %v92_v13 = vpop.f32.mrf.mxu0 }
  0x94   :  { %v135_v14 = vrot.slane %v92_v13, 4  ;;  %v112_v15 = vpop.f32.mrf.mxu1 }
  0x95   :  { %v141_v16 = vrot.slane %v112_v15, 4 }
  0x96   :  { %v136_v17 = vmax.f32 %v92_v13, %v135_v14 }
  0x97   :  { %v142_v18 = vmax.f32 %v112_v15, %v141_v16 }
  0x98   :  { %v137_v19 = vrot.slane %v136_v17, 2 }
  0x99   :  { %v143_v20 = vrot.slane %v142_v18, 2 }
  0x9a   :  { %v138_v21 = vmax.f32 %v136_v17, %v137_v19  ;;  %v132_v22 = vpop.f32.mrf.mxu2 }
  0x9b   :  { %v144_v24 = vmax.f32 %v142_v18, %v143_v20  ;;  %v147_v25 = vrot.slane %v132_v22, 4 }
  0x9c   :  { %v139_v26 = vrot.slane %v138_v21, 1 }
  0x9d   :  { %v145_v27 = vrot.slane %v144_v24, 1  ;;  %v148_v28 = vmax.f32 %v132_v22, %v147_v25 }
  0x9e   :  { %v140_v30 = vmax.f32 %v138_v21, %v139_v26 }
  0x9f   :  { %v146_v31 = vmax.f32 %v144_v24, %v145_v27  ;;  %v149_v33 = vrot.slane %v148_v28, 2 }
  0xa0   :  { %v161_v35 = vadd.f32 %v155_v29, %v140_v30 }
  0xa1   :  { %v150_v34 = vmax.f32 %v148_v28, %v149_v33  ;;  %v162_v36 = vadd.f32 %v156_v32, %v146_v31 }
  0xa3   :  { %v151_v37 = vrot.slane %v150_v34, 1  ;;  %v164_v41 = vmax.f32 %v161_v35, %v162_v36 }
  0xa5   :  { %v152_v39 = vmax.f32 %v150_v34, %v151_v37 }
  0xa7   :  { %v163_v40 = vadd.f32 %v157_v38, %v152_v39 }
  0xa9   :  { %v165_v42 = vmax.f32 %v164_v41, %v163_v40 }
  0xab   :  { %166 = vst [vmem:[#allocation8] sm:$0x1] %v165_v42 }
  0xac   :  { %177 = dma.vmem_to_hbm [thread:$0]  %s173_s2, 16, %s175_s30, [#allocation4]  }
  0xad   :  { %294 = dma.done.wait [#allocation4], 16  }
  0xae   :  { %295 = vsyncadd [#allocation4], 4294967280 }
  0xaf   :  { %182 = vsyncpa [#allocation3], 1 }
  0xb0   :  { %183 = vsyncpa [#allocation6], 1 }
  0xb1   :  { %184 = vsyncpa [#allocation4], 1 }

</bundles_post_ra>
